<compile_context>
chip_gen: v6e
topology: v6e:2x2x1
jax: 0.10.0
libtpu: 0.0.40
codegen_flags: <defaults>
</compile_context>

<pallas_src>
import jax
import jax.numpy as jnp
from jax.experimental import pallas as pl
from jax.experimental.pallas import tpu as pltpu


def _round_up(v: int, m: int) -> int:
    return ((v + m - 1) // m) * m


def linear_kernel(x_ref, w_ref, b_ref, o_ref):
    # x_ref: (IN, TB) VMEM feature-major tile (batch on the lane axis).
    # w_ref: (IN, 1)  VMEM weight column, resident across grid steps.
    # b_ref: (1,)     SMEM scalar bias.
    # o_ref: (1, TB)  VMEM lane-dense output slab.
    x = x_ref[...]                                    # (IN, TB) f32
    w = w_ref[...]                                    # (IN, 1)  f32, lane-broadcasts
    y = jnp.sum(x * w, axis=0, keepdims=True)         # (1, TB)  sublane reduce
    o_ref[...] = (y + b_ref[0]).astype(o_ref.dtype)   # scalar bias from SMEM


def dummy_model_forward(x, weight, bias, *, block_lanes=8192,
                        min_pallas_batch=1024, force_pallas=False):
    """Pallas equivalent of DummyModel.forward: nn.Linear(10, 1)(x).

    x:      (B, IN) input
    weight: (OUT, IN) PyTorch-convention weight (OUT must be 1)
    bias:   (OUT,) bias
    """
    B, IN = x.shape
    OUT = weight.shape[0]
    assert OUT == 1, "DummyModel has a single output feature"
    assert block_lanes % 128 == 0

    if not force_pallas and B < min_pallas_batch:
        # Tiny batch: a Pallas launch is pure fixed overhead for ~2*B*IN FLOPs;
        # XLA's fused elementwise path wins outright.
        return (x @ weight.T + bias).astype(x.dtype)

    # --- wrapper-side layout plumbing (one HBM pass, outside the kernel) ----
    # Feature-major: batch on the 128-lane axis, features on sublanes.
    lanes = _round_up(B, 128)
    x_t = jnp.zeros((IN, lanes), jnp.float32).at[:, :B].set(
        x.astype(jnp.float32).T)
    # (OUT, IN) = (1, IN) row -> (IN, 1) column (same values, lane-broadcastable).
    w_col = weight.astype(jnp.float32).reshape(IN, 1)
    b_vec = bias.astype(jnp.float32).reshape(OUT)          # (1,) scalar -> SMEM

    # --- tiling --------------------------------------------------------------
    tb = min(block_lanes, lanes)
    n_steps = pl.cdiv(lanes, tb)
    if n_steps == 1 and lanes >= 2048:
        # Large single-step batch: split in two so both v7x TensorCores get a
        # "parallel" grid step (neutral on single-core v5e/v6e).
        tb = _round_up(lanes // 2, 128)
        n_steps = pl.cdiv(lanes, tb)

    cost = pl.CostEstimate(
        flops=2 * B * IN,
        transcendentals=0,
        bytes_accessed=4 * (lanes * IN + lanes + IN + 1),
    )

    out = pl.pallas_call(
        linear_kernel,
        out_shape=jax.ShapeDtypeStruct((1, lanes), x.dtype),
        grid=(n_steps,),
        in_specs=[
            pl.BlockSpec((IN, tb), lambda i: (0, i)),            # x: lane-dense tile
            pl.BlockSpec((IN, 1), lambda i: (0, 0)),             # weight: resident column
            pl.BlockSpec(memory_space=pltpu.MemorySpace.SMEM),   # bias: SMEM scalar
        ],
        out_specs=pl.BlockSpec((1, tb), lambda i: (0, i)),       # lane-dense output slab
        compiler_params=pltpu.CompilerParams(
            dimension_semantics=("parallel",),
        ),
        cost_estimate=cost,
    )(x_t, w_col, b_vec)

    # (1, lanes) -> (B, OUT): free layout plumbing outside the kernel.
    return out[0, :B].reshape(B, OUT)


if __name__ == "__main__":
    key = jax.random.PRNGKey(0)
    k_x, k_w, k_b, k_x2 = jax.random.split(key, 4)

    IN, OUT = 10, 1

    # Deterministic params mimicking nn.Linear's uniform(-1/sqrt(IN), 1/sqrt(IN)).
    bound = 1.0 / (IN ** 0.5)
    weight = jax.random.uniform(k_w, (OUT, IN), jnp.float32, -bound, bound)
    bias = jax.random.uniform(k_b, (OUT,), jnp.float32, -bound, bound)

    # Small batch implied by the module's forward.
    B = 8
    x = jax.random.normal(k_x, (B, IN), jnp.float32)
    ref = x @ weight.T + bias

    # Force the Pallas path so the kernel itself runs at the test shape.
    out = jax.block_until_ready(
        dummy_model_forward(x, weight, bias, force_pallas=True))
    assert out.shape == (B, OUT), out.shape
    assert jnp.allclose(out, ref, atol=1e-5, rtol=1e-5), "pallas mismatch"

    # Ragged medium batch: exercises 128-lane padding and a multi-step grid.
    B2 = 300
    x2 = jax.random.normal(k_x2, (B2, IN), jnp.float32)
    ref2 = x2 @ weight.T + bias
    out2 = jax.block_until_ready(
        dummy_model_forward(x2, weight, bias, block_lanes=128,
                            force_pallas=True))
    assert out2.shape == (B2, OUT), out2.shape
    assert jnp.allclose(out2, ref2, atol=1e-5, rtol=1e-5), "pallas mismatch (ragged)"

    # Default dispatch at tiny B falls back to plain XLA (same semantics).
    out3 = jax.block_until_ready(dummy_model_forward(x, weight, bias))
    assert jnp.allclose(out3, ref, atol=1e-5, rtol=1e-5), "fallback mismatch"

    print("KERNEL_OK")
</pallas_src>

<mosaic_0001>
module attributes {stable_mosaic.version = 11 : i64} {
  func.func @linear_kernel(%arg0: i32, %arg1: memref<10x128xf32, #tpu.memory_space<vmem>>, %arg2: memref<10x1xf32, #tpu.memory_space<vmem>>, %arg3: memref<1xf32, #tpu.memory_space<smem>>, %arg4: memref<1x128xf32, #tpu.memory_space<vmem>>) attributes {dimension_semantics = [#tpu.dimension_semantics<parallel>], iteration_bounds = array<i64: 1>, scalar_prefetch = 0 : i64, scratch_operands = 0 : i64, tpu.core_type = #tpu.core_type<tc>, window_params = [{transform_indices = @transform_0, window_bounds = array<i64: 10, 128>}, {pipeline_mode = #tpu.pipeline_mode<synchronous>, transform_indices = @transform_1, window_bounds = array<i64: 10, 1>}, {transform_indices = @transform_2, window_bounds = array<i64: 1>}, {transform_indices = @transform_3, window_bounds = array<i64: 1, 128>}]} {
    %c0 = arith.constant 0 : index
    %c0_0 = arith.constant 0 : index
    %0 = vector.load %arg1[%c0, %c0_0] : memref<10x128xf32, #tpu.memory_space<vmem>>, vector<10x128xf32>
    %c0_1 = arith.constant 0 : index
    %c0_2 = arith.constant 0 : index
    %1 = vector.load %arg2[%c0_1, %c0_2] : memref<10x1xf32, #tpu.memory_space<vmem>>, vector<10x1xf32>
    %2 = vector.broadcast %1 : vector<10x1xf32> to vector<10x128xf32>
    %3 = arith.mulf %0, %2 : vector<10x128xf32>
    %cst = arith.constant dense<0.000000e+00> : vector<128xf32>
    %4 = vector.multi_reduction <add>, %3, %cst [0] : vector<10x128xf32> to vector<128xf32>
    %5 = vector.shape_cast %4 : vector<128xf32> to vector<1x128xf32>
    %c0_3 = arith.constant 0 : index
    %6 = memref.load %arg3[%c0_3] : memref<1xf32, #tpu.memory_space<smem>>
    %7 = vector.broadcast %6 : f32 to vector<1x128xf32>
    %8 = arith.addf %5, %7 : vector<1x128xf32>
    %c0_4 = arith.constant 0 : index
    %c0_5 = arith.constant 0 : index
    %9 = vector.load %arg4[%c0_4, %c0_5] : memref<1x128xf32, #tpu.memory_space<vmem>>, vector<1x128xf32>
    tpu.vector_store %arg4[%c0_4, %c0_5], %8 {strides = array<i32>} : memref<1x128xf32, #tpu.memory_space<vmem>>, vector<1x128xf32>,
    return
  }
  func.func @transform_0(%arg0: i32) -> (i32, i32) {
    %c0_i32 = arith.constant 0 : i32
    %c0_i32_0 = arith.constant 0 : i32
    return %c0_i32, %arg0 : i32, i32
  }
  func.func @transform_1(%arg0: i32) -> (i32, i32) {
    %c0_i32 = arith.constant 0 : i32
    %c0_i32_0 = arith.constant 0 : i32
    %c0_i32_1 = arith.constant 0 : i32
    return %c0_i32, %c0_i32_0 : i32, i32
  }
  func.func @transform_2(%arg0: i32) -> i32 {
    %c0_i32 = arith.constant 0 : i32
    %c0_i32_0 = arith.constant 0 : i32
    return %c0_i32 : i32
  }
  func.func @transform_3(%arg0: i32) -> (i32, i32) {
    %c0_i32 = arith.constant 0 : i32
    %c0_i32_0 = arith.constant 0 : i32
    return %c0_i32, %arg0 : i32, i32
  }
}

</mosaic_0001>

<bundles_post_ra>
// kernel: tpu_custom_call.1
= control target key start
LH: loop header
LB: loop body
LE: loop exit
PB: predicated region body
PF: predicated region fallthrough
CT: control target
= control target key end

     0   :  { %v84_v1 = vmov 0   ;;  %s124_s0 = inlined_call_operand.vmem [shape: f32[10,128], index: 0, kind: input, shape index: {}]   ;;  %s125_s1 = inlined_call_operand.vmem [shape: f32[10,1], index: 1, kind: input, shape index: {}]   ;;  %s126_s2 = inlined_call_operand.<no memory space> [shape: f32[1], index: 2, kind: input, shape index: {}]   ;;  %s127_s3 = inlined_call_operand.hbm [shape: f32[1,128], index: 3, kind: output, shape index: {}]  }
   0x1   :  { %v19_v0 = vld [vmem:[%s125_s1 + $0x8] sm:$0x3]  ;;  %61 = vset.pattern.permute.xlu0 %v84_v1 }
   0x2   :  { %9 = vsyncpa [#allocation4], 0  ;;  %27 = vperm.xlu0 %61, %v19_v0   ;;  %v18_v2 = vld [vmem:[%s125_s1] sm:$0xff]  ;;  %v17_v3 = vld [vmem:[%s124_s0 + $0x8] sm:$0x3]  ;;  %vm32_vm0 = vcmask 1041408   ;;  %v42_v16 = vstv %s126_s2 }
   0x3   :  { %v16_v6 = vld [vmem:[%s124_s0] sm:$0xff]  ;;  %s85_s21 = smov [#allocation3]  }
   0x4   :  { %s51_s22 = sshll.u32 %s85_s21, 4  ;;  %s52_s22 = int_to_ptr.vmem [resolvable:$true] %s51_s22 }
   0x5   :  { %s62_s0 = scalar_lea.vmem %s52_s22, 16  ;;  %s66_s23 = scalar_lea.vmem %s52_s22, 32 }
   0x6   :  { %22 = vperm.xlu0 %61, %v18_v2   ;;  %p63_p0 = scmp.ne.s32.totalorder %s52_s22, %s62_s0  ;;  %p67_p1 = scmp.lt.s32.totalorder %s52_s22, %s52_s22 }
   0x7   :  { %p68_p2 = scmp.lt.s32.totalorder %s66_s23, %s62_s0 }
   0x9   :  { %p69_p3 = por %p68_p2, %p67_p1 }
   0xb   :  { %p70_p4 = pnand %p69_p3, %p63_p0 }
  0x7d   :  { %v28_v4 = vpop.permute.xlu0 %27 }
  0x7e   :  { %v31_v5 = vmul.f32 %v28_v4, %v17_v3 }
  0x80   :  { %v33_v9 = vsel %vm32_vm0, %v31_v5, 0.0 }
  0x81   :  { %v23_v7 = vpop.permute.xlu0 %22 }
  0x82   :  { %v30_v8 = vmul.f32 %v23_v7, %v16_v6 }
  0x84   :  { %v34_v10 = vadd.f32 %v33_v9, %v30_v8 }
  0x86   :  { %v35_v11 = vrot.slane %v34_v10, 4 }
  0x88   :  { %v36_v12 = vadd.f32 %v35_v11, %v34_v10 }
  0x8a   :  { %v37_v13 = vrot.slane %v36_v12, 2 }
  0x8c   :  { %v38_v14 = vadd.f32 %v37_v13, %v36_v12 }
  0x8e   :  { %v39_v15 = vrot.slane %v38_v14, 1 }
  0x90   :  { %v40_v17 = vadd.f32 %v39_v15, %v38_v14 }
  0x92   :  { %v43_v18 = vadd.f32 %v42_v16, %v40_v17 }
  0x94   :  { %44 = vst [vmem:[#allocation3] sm:$0x1] %v43_v18 }
  0x95   :  { %73 = shalt.err (!%p70_p4)
}
  0x96   :  { %54 = dma.vmem_to_hbm [thread:$0]  %s52_s22, 16, %s127_s3, [#allocation4]  }
  0x97   :  { %82 = dma.done.wait [#allocation4], 16  }
  0x98   :  { %83 = vsyncadd [#allocation4], 4294967280 }
  0x99   :  { %58 = vsyncpa [#allocation4], 1 }

</bundles_post_ra>
